<compile_context>
chip_gen: v7x
topology: tpu7x:2x2x1
jax: 0.10.0
libtpu: 0.0.40
codegen_flags: <defaults>
</compile_context>

<pallas_src>
import functools

import numpy as np

import jax
import jax.numpy as jnp
from jax import lax
from jax.experimental import pallas as pl
from jax.experimental.pallas import tpu as pltpu


# -----------------------------------------------------------------------------
# Static interpolation matrix (built once at trace time with numpy).
# Row j of the (2n+2, n) matrix gives the weights producing padded position j-1 of
# [ bilinear-2x-upsample (align_corners=False) -> ReflectionPad2d(1) ] from n samples.
# -----------------------------------------------------------------------------
def _upsample2x_reflectpad_matrix(n):
    m = np.zeros((2 * n + 2, n), dtype=np.float32)
    for j in range(2 * n + 2):
        p = j - 1                                                # padded position in [-1, 2n]
        u = 1 if p == -1 else (2 * n - 2 if p == 2 * n else p)   # reflection pad
        src = max(0.5 * u - 0.25, 0.0)                           # PyTorch source index
        k0 = int(np.floor(src))
        f = src - k0
        k1 = min(k0 + 1, n - 1)
        m[j, k0] += 1.0 - f
        m[j, k1] += f
    return m


# -----------------------------------------------------------------------------
# Fused kernel: one (batch, output-row-tile) step.  All contraction work on the MXU.
# -----------------------------------------------------------------------------
def _fused_upsample_conv_kernel(x_ref, uh_ref, wu_ref, b_ref, o_ref, *, cin, th, nl):
    # x_ref : (1, Cin, H, W)        source image (VMEM-resident across a batch's row tiles)
    # uh_ref: (3, TH, H)            per-dy H-axis upsample+pad rows for this row tile
    # wu_ref: (Cin, 3, W, Cout*Wo)  conv-weight-folded W-axis upsample+pad matrices
    # b_ref : (1, Cout*Wo)          bias, repeated Wo times per output channel
    # o_ref : (1, TH, Cout*Wo)      output row tile; lane index = co*Wo + s (lane-dense)
    acc = jnp.zeros((th, nl), jnp.float32)
    for ci in range(cin):
        x_ci = x_ref[0, ci].astype(jnp.float32)                                      # (H, W)
        for dy in range(3):
            # H-axis upsample+pad rows for conv row-tap dy (MXU).
            xh = jnp.dot(uh_ref[dy], x_ci, preferred_element_type=jnp.float32)       # (TH, W)
            # W-axis upsample+pad fused with the (dx, co) conv contraction (MXU).
            acc = acc + jnp.dot(xh, wu_ref[ci, dy],
                                preferred_element_type=jnp.float32)                  # (TH, NL)
    o_ref[0] = (acc + b_ref[0]).astype(o_ref.dtype)


# -----------------------------------------------------------------------------
# Row-tile selection: large tiles (few grid steps), vreg-friendly accumulator,
# >= 2 grid steps when B == 1 so both v7x TensorCores get work.
# -----------------------------------------------------------------------------
def _pick_row_tile(ho, batch, nl):
    if ho % 8 != 0:
        return ho                                        # single whole-image tile fallback
    cap = max(8, ((64 * 1024) // (4 * nl)) // 8 * 8)     # keep f32 acc near vreg budget
    cands = [t for t in range(8, ho + 1, 8) if ho % t == 0 and t <= cap]
    th = cands[-1] if cands else 8
    if batch == 1 and th == ho:
        lower = [t for t in cands if t < ho]
        if lower:
            th = lower[-1]                               # keep >= 2 'parallel' steps (v7x)
    return th


# -----------------------------------------------------------------------------
# Public forward: NCHW in / NCHW out, same semantics as the PyTorch UpsampleBlock.
# -----------------------------------------------------------------------------
def upsample_block_forward(x, weight, bias):
    """x: (B, Cin, H, W); weight: (Cout, Cin, 3, 3); bias: (Cout,) -> (B, Cout, 2H, 2W)."""
    B, Cin, H, W = x.shape
    Cout = weight.shape[0]
    assert weight.shape == (Cout, Cin, 3, 3)
    Ho, Wo = 2 * H, 2 * W
    NL = Cout * Wo                                       # lane width of the fused output slab

    th = _pick_row_tile(Ho, B, NL)
    n_tiles = Ho // th

    # Static interpolation matrices.
    uh_full = _upsample2x_reflectpad_matrix(H)                                    # (Ho+2, H)
    uw_full = _upsample2x_reflectpad_matrix(W)                                    # (Wo+2, W)
    # Per-dy row views so the kernel's loads stay tile-aligned (no dynamic sublane shifts).
    uh3 = jnp.asarray(np.stack([uh_full[dy:dy + Ho, :] for dy in range(3)]))      # (3, Ho, H)
    # Fold conv weights + dx taps + output channels into the W-axis matrix:
    #   wu[ci, dy, w, co*Wo + s] = sum_dx weight[co, ci, dy, dx] * uw_full[s + dx, w]
    uw_sl = jnp.asarray(np.stack([uw_full[dx:dx + Wo, :] for dx in range(3)]))    # (3, Wo, W)
    wu = jnp.einsum('oida,asw->idwos', weight.astype(jnp.float32), uw_sl)
    wu = wu.reshape(Cin, 3, W, NL)                                                # (Cin,3,W,NL)
    b_row = jnp.repeat(bias.astype(jnp.float32), Wo)[None, :]                     # (1, NL)

    kernel = functools.partial(_fused_upsample_conv_kernel, cin=Cin, th=th, nl=NL)

    out = pl.pallas_call(
        kernel,
        out_shape=jax.ShapeDtypeStruct((B, Ho, NL), x.dtype),
        grid=(B, n_tiles),
        in_specs=[
            # Whole (small) source image per batch; constant over the row-tile axis ->
            # DMA'd once per batch, resident in VMEM across its row tiles.
            pl.BlockSpec((1, Cin, H, W), lambda b, i: (b, 0, 0, 0)),
            pl.BlockSpec((3, th, H), lambda b, i: (0, i, 0)),
            pl.BlockSpec((Cin, 3, W, NL), lambda b, i: (0, 0, 0, 0)),
            pl.BlockSpec((1, NL), lambda b, i: (0, 0)),
        ],
        out_specs=pl.BlockSpec((1, th, NL), lambda b, i: (b, i, 0)),
        compiler_params=pltpu.CompilerParams(
            dimension_semantics=("parallel", "parallel"),
            vmem_limit_bytes=32 * 1024 * 1024,
        ),
    )(x, uh3, wu, b_row)

    # (B, Ho, Cout, Wo) -> NCHW.  One cheap XLA pass over the output; keeps every
    # in-kernel store and writeback DMA lane-dense.
    return out.reshape(B, Ho, Cout, Wo).transpose(0, 2, 1, 3)


# -----------------------------------------------------------------------------
# Pure-JAX reference (PyTorch semantics) for the self-test.
# -----------------------------------------------------------------------------
def _reference_forward(x, weight, bias):
    def up2(a, axis):
        n = a.shape[axis]
        dst = jnp.arange(2 * n, dtype=jnp.float32)
        src = jnp.maximum(0.5 * dst - 0.25, 0.0)
        i0 = jnp.floor(src).astype(jnp.int32)
        f = src - i0.astype(jnp.float32)
        i1 = jnp.minimum(i0 + 1, n - 1)
        shape = [1] * a.ndim
        shape[axis] = 2 * n
        f = f.reshape(shape)
        return jnp.take(a, i0, axis=axis) * (1.0 - f) + jnp.take(a, i1, axis=axis) * f

    xu = up2(up2(x, 2), 3)
    xp = jnp.pad(xu, ((0, 0), (0, 0), (1, 1), (1, 1)), mode="reflect")
    y = lax.conv_general_dilated(
        xp, weight, window_strides=(1, 1), padding="VALID",
        dimension_numbers=("NCHW", "OIHW", "NCHW"))
    return y + bias[None, :, None, None]


if __name__ == "__main__":
    B, Cin, H, W = 2, 4, 16, 16
    Cout = 8

    key = jax.random.PRNGKey(0)
    kx, kw, kb = jax.random.split(key, 3)

    x = jax.random.normal(kx, (B, Cin, H, W), dtype=jnp.float32)
    # deterministic parameter init (kaiming-uniform-like bound, as in nn.Conv2d)
    fan_in = Cin * 3 * 3
    bound = 1.0 / (fan_in ** 0.5)
    w = jax.random.uniform(kw, (Cout, Cin, 3, 3), jnp.float32, -bound, bound)
    b = jax.random.uniform(kb, (Cout,), jnp.float32, -bound, bound)

    fwd = jax.jit(upsample_block_forward)
    y = jax.block_until_ready(fwd(x, w, b))
    assert y.shape == (B, Cout, 2 * H, 2 * W), y.shape

    y_ref = jax.block_until_ready(_reference_forward(x, w, b))
    max_err = float(jnp.max(jnp.abs(y - y_ref)))
    assert jnp.allclose(y, y_ref, atol=1e-3, rtol=1e-3), max_err

    print("KERNEL_OK")
</pallas_src>

<mosaic_0001>
module attributes {stable_mosaic.version = 11 : i64} {
  func.func @_fused_upsample_conv_kernel(%arg0: i32, %arg1: i32, %arg2: memref<1x4x16x16xf32, #tpu.memory_space<vmem>>, %arg3: memref<3x32x16xf32, #tpu.memory_space<vmem>>, %arg4: memref<4x3x16x256xf32, #tpu.memory_space<vmem>>, %arg5: memref<1x256xf32, #tpu.memory_space<vmem>>, %arg6: memref<1x32x256xf32, #tpu.memory_space<vmem>>) attributes {dimension_semantics = [#tpu.dimension_semantics<parallel>, #tpu.dimension_semantics<parallel>], iteration_bounds = array<i64: 2, 1>, scalar_prefetch = 0 : i64, scratch_operands = 0 : i64, tpu.core_type = #tpu.core_type<tc>, window_params = [{transform_indices = @transform_0, window_bounds = array<i64: 1, 4, 16, 16>}, {transform_indices = @transform_1, window_bounds = array<i64: 3, 32, 16>}, {pipeline_mode = #tpu.pipeline_mode<synchronous>, transform_indices = @transform_2, window_bounds = array<i64: 4, 3, 16, 256>}, {pipeline_mode = #tpu.pipeline_mode<synchronous>, transform_indices = @transform_3, window_bounds = array<i64: 1, 256>}, {transform_indices = @transform_4, window_bounds = array<i64: 1, 32, 256>}]} {
    %cst = arith.constant 0.000000e+00 : f32
    %0 = vector.broadcast %cst : f32 to vector<32x256xf32>
    %c0 = arith.constant 0 : index
    %c0_0 = arith.constant 0 : index
    %c0_1 = arith.constant 0 : index
    %c0_2 = arith.constant 0 : index
    %1 = vector.load %arg2[%c0, %c0_0, %c0_1, %c0_2] : memref<1x4x16x16xf32, #tpu.memory_space<vmem>>, vector<1x1x16x16xf32>
    %2 = vector.shape_cast %1 : vector<1x1x16x16xf32> to vector<16x16xf32>
    %c0_3 = arith.constant 0 : index
    %c0_4 = arith.constant 0 : index
    %c0_5 = arith.constant 0 : index
    %3 = vector.load %arg3[%c0_3, %c0_4, %c0_5] : memref<3x32x16xf32, #tpu.memory_space<vmem>>, vector<1x32x16xf32>
    %4 = vector.shape_cast %3 : vector<1x32x16xf32> to vector<32x16xf32>
    %cst_6 = arith.constant dense<0.000000e+00> : vector<32x16xf32>
    %5 = tpu.matmul %4, %2, %cst_6 {dimension_numbers = #tpu.dot_dimension_numbers<[1], [0], [0], [1], [0, 0, 1, 1], [], []>} : vector<32x16xf32>, vector<16x16xf32>, vector<32x16xf32> -> vector<32x16xf32>
    %c0_7 = arith.constant 0 : index
    %c0_8 = arith.constant 0 : index
    %c0_9 = arith.constant 0 : index
    %c0_10 = arith.constant 0 : index
    %6 = vector.load %arg4[%c0_7, %c0_8, %c0_9, %c0_10] : memref<4x3x16x256xf32, #tpu.memory_space<vmem>>, vector<1x1x16x256xf32>
    %7 = vector.shape_cast %6 : vector<1x1x16x256xf32> to vector<16x256xf32>
    %cst_11 = arith.constant dense<0.000000e+00> : vector<32x256xf32>
    %8 = tpu.matmul %5, %7, %cst_11 {dimension_numbers = #tpu.dot_dimension_numbers<[1], [0], [0], [1], [0, 0, 1, 1], [], []>} : vector<32x16xf32>, vector<16x256xf32>, vector<32x256xf32> -> vector<32x256xf32>
    %9 = arith.addf %0, %8 : vector<32x256xf32>
    %c1 = arith.constant 1 : index
    %c0_12 = arith.constant 0 : index
    %c0_13 = arith.constant 0 : index
    %10 = vector.load %arg3[%c1, %c0_12, %c0_13] : memref<3x32x16xf32, #tpu.memory_space<vmem>>, vector<1x32x16xf32>
    %11 = vector.shape_cast %10 : vector<1x32x16xf32> to vector<32x16xf32>
    %cst_14 = arith.constant dense<0.000000e+00> : vector<32x16xf32>
    %12 = tpu.matmul %11, %2, %cst_14 {dimension_numbers = #tpu.dot_dimension_numbers<[1], [0], [0], [1], [0, 0, 1, 1], [], []>} : vector<32x16xf32>, vector<16x16xf32>, vector<32x16xf32> -> vector<32x16xf32>
    %c0_15 = arith.constant 0 : index
    %c1_16 = arith.constant 1 : index
    %c0_17 = arith.constant 0 : index
    %c0_18 = arith.constant 0 : index
    %13 = vector.load %arg4[%c0_15, %c1_16, %c0_17, %c0_18] : memref<4x3x16x256xf32, #tpu.memory_space<vmem>>, vector<1x1x16x256xf32>
    %14 = vector.shape_cast %13 : vector<1x1x16x256xf32> to vector<16x256xf32>
    %cst_19 = arith.constant dense<0.000000e+00> : vector<32x256xf32>
    %15 = tpu.matmul %12, %14, %cst_19 {dimension_numbers = #tpu.dot_dimension_numbers<[1], [0], [0], [1], [0, 0, 1, 1], [], []>} : vector<32x16xf32>, vector<16x256xf32>, vector<32x256xf32> -> vector<32x256xf32>
    %16 = arith.addf %9, %15 : vector<32x256xf32>
    %c2 = arith.constant 2 : index
    %c0_20 = arith.constant 0 : index
    %c0_21 = arith.constant 0 : index
    %17 = vector.load %arg3[%c2, %c0_20, %c0_21] : memref<3x32x16xf32, #tpu.memory_space<vmem>>, vector<1x32x16xf32>
    %18 = vector.shape_cast %17 : vector<1x32x16xf32> to vector<32x16xf32>
    %cst_22 = arith.constant dense<0.000000e+00> : vector<32x16xf32>
    %19 = tpu.matmul %18, %2, %cst_22 {dimension_numbers = #tpu.dot_dimension_numbers<[1], [0], [0], [1], [0, 0, 1, 1], [], []>} : vector<32x16xf32>, vector<16x16xf32>, vector<32x16xf32> -> vector<32x16xf32>
    %c0_23 = arith.constant 0 : index
    %c2_24 = arith.constant 2 : index
    %c0_25 = arith.constant 0 : index
    %c0_26 = arith.constant 0 : index
    %20 = vector.load %arg4[%c0_23, %c2_24, %c0_25, %c0_26] : memref<4x3x16x256xf32, #tpu.memory_space<vmem>>, vector<1x1x16x256xf32>
    %21 = vector.shape_cast %20 : vector<1x1x16x256xf32> to vector<16x256xf32>
    %cst_27 = arith.constant dense<0.000000e+00> : vector<32x256xf32>
    %22 = tpu.matmul %19, %21, %cst_27 {dimension_numbers = #tpu.dot_dimension_numbers<[1], [0], [0], [1], [0, 0, 1, 1], [], []>} : vector<32x16xf32>, vector<16x256xf32>, vector<32x256xf32> -> vector<32x256xf32>
    %23 = arith.addf %16, %22 : vector<32x256xf32>
    %c0_28 = arith.constant 0 : index
    %c1_29 = arith.constant 1 : index
    %c0_30 = arith.constant 0 : index
    %c0_31 = arith.constant 0 : index
    %24 = vector.load %arg2[%c0_28, %c1_29, %c0_30, %c0_31] : memref<1x4x16x16xf32, #tpu.memory_space<vmem>>, vector<1x1x16x16xf32>
    %25 = vector.shape_cast %24 : vector<1x1x16x16xf32> to vector<16x16xf32>
    %c0_32 = arith.constant 0 : index
    %c0_33 = arith.constant 0 : index
    %c0_34 = arith.constant 0 : index
    %26 = vector.load %arg3[%c0_32, %c0_33, %c0_34] : memref<3x32x16xf32, #tpu.memory_space<vmem>>, vector<1x32x16xf32>
    %27 = vector.shape_cast %26 : vector<1x32x16xf32> to vector<32x16xf32>
    %cst_35 = arith.constant dense<0.000000e+00> : vector<32x16xf32>
    %28 = tpu.matmul %27, %25, %cst_35 {dimension_numbers = #tpu.dot_dimension_numbers<[1], [0], [0], [1], [0, 0, 1, 1], [], []>} : vector<32x16xf32>, vector<16x16xf32>, vector<32x16xf32> -> vector<32x16xf32>
    %c1_36 = arith.constant 1 : index
    %c0_37 = arith.constant 0 : index
    %c0_38 = arith.constant 0 : index
    %c0_39 = arith.constant 0 : index
    %29 = vector.load %arg4[%c1_36, %c0_37, %c0_38, %c0_39] : memref<4x3x16x256xf32, #tpu.memory_space<vmem>>, vector<1x1x16x256xf32>
    %30 = vector.shape_cast %29 : vector<1x1x16x256xf32> to vector<16x256xf32>
    %cst_40 = arith.constant dense<0.000000e+00> : vector<32x256xf32>
    %31 = tpu.matmul %28, %30, %cst_40 {dimension_numbers = #tpu.dot_dimension_numbers<[1], [0], [0], [1], [0, 0, 1, 1], [], []>} : vector<32x16xf32>, vector<16x256xf32>, vector<32x256xf32> -> vector<32x256xf32>
    %32 = arith.addf %23, %31 : vector<32x256xf32>
    %c1_41 = arith.constant 1 : index
    %c0_42 = arith.constant 0 : index
    %c0_43 = arith.constant 0 : index
    %33 = vector.load %arg3[%c1_41, %c0_42, %c0_43] : memref<3x32x16xf32, #tpu.memory_space<vmem>>, vector<1x32x16xf32>
    %34 = vector.shape_cast %33 : vector<1x32x16xf32> to vector<32x16xf32>
    %cst_44 = arith.constant dense<0.000000e+00> : vector<32x16xf32>
    %35 = tpu.matmul %34, %25, %cst_44 {dimension_numbers = #tpu.dot_dimension_numbers<[1], [0], [0], [1], [0, 0, 1, 1], [], []>} : vector<32x16xf32>, vector<16x16xf32>, vector<32x16xf32> -> vector<32x16xf32>
    %c1_45 = arith.constant 1 : index
    %c1_46 = arith.constant 1 : index
    %c0_47 = arith.constant 0 : index
    %c0_48 = arith.constant 0 : index
    %36 = vector.load %arg4[%c1_45, %c1_46, %c0_47, %c0_48] : memref<4x3x16x256xf32, #tpu.memory_space<vmem>>, vector<1x1x16x256xf32>
    %37 = vector.shape_cast %36 : vector<1x1x16x256xf32> to vector<16x256xf32>
    %cst_49 = arith.constant dense<0.000000e+00> : vector<32x256xf32>
    %38 = tpu.matmul %35, %37, %cst_49 {dimension_numbers = #tpu.dot_dimension_numbers<[1], [0], [0], [1], [0, 0, 1, 1], [], []>} : vector<32x16xf32>, vector<16x256xf32>, vector<32x256xf32> -> vector<32x256xf32>
    %39 = arith.addf %32, %38 : vector<32x256xf32>
    %c2_50 = arith.constant 2 : index
    %c0_51 = arith.constant 0 : index
    %c0_52 = arith.constant 0 : index
    %40 = vector.load %arg3[%c2_50, %c0_51, %c0_52] : memref<3x32x16xf32, #tpu.memory_space<vmem>>, vector<1x32x16xf32>
    %41 = vector.shape_cast %40 : vector<1x32x16xf32> to vector<32x16xf32>
    %cst_53 = arith.constant dense<0.000000e+00> : vector<32x16xf32>
    %42 = tpu.matmul %41, %25, %cst_53 {dimension_numbers = #tpu.dot_dimension_numbers<[1], [0], [0], [1], [0, 0, 1, 1], [], []>} : vector<32x16xf32>, vector<16x16xf32>, vector<32x16xf32> -> vector<32x16xf32>
    %c1_54 = arith.constant 1 : index
    %c2_55 = arith.constant 2 : index
    %c0_56 = arith.constant 0 : index
    %c0_57 = arith.constant 0 : index
    %43 = vector.load %arg4[%c1_54, %c2_55, %c0_56, %c0_57] : memref<4x3x16x256xf32, #tpu.memory_space<vmem>>, vector<1x1x16x256xf32>
    %44 = vector.shape_cast %43 : vector<1x1x16x256xf32> to vector<16x256xf32>
    %cst_58 = arith.constant dense<0.000000e+00> : vector<32x256xf32>
    %45 = tpu.matmul %42, %44, %cst_58 {dimension_numbers = #tpu.dot_dimension_numbers<[1], [0], [0], [1], [0, 0, 1, 1], [], []>} : vector<32x16xf32>, vector<16x256xf32>, vector<32x256xf32> -> vector<32x256xf32>
    %46 = arith.addf %39, %45 : vector<32x256xf32>
    %c0_59 = arith.constant 0 : index
    %c2_60 = arith.constant 2 : index
    %c0_61 = arith.constant 0 : index
    %c0_62 = arith.constant 0 : index
    %47 = vector.load %arg2[%c0_59, %c2_60, %c0_61, %c0_62] : memref<1x4x16x16xf32, #tpu.memory_space<vmem>>, vector<1x1x16x16xf32>
    %48 = vector.shape_cast %47 : vector<1x1x16x16xf32> to vector<16x16xf32>
    %c0_63 = arith.constant 0 : index
    %c0_64 = arith.constant 0 : index
    %c0_65 = arith.constant 0 : index
    %49 = vector.load %arg3[%c0_63, %c0_64, %c0_65] : memref<3x32x16xf32, #tpu.memory_space<vmem>>, vector<1x32x16xf32>
    %50 = vector.shape_cast %49 : vector<1x32x16xf32> to vector<32x16xf32>
    %cst_66 = arith.constant dense<0.000000e+00> : vector<32x16xf32>
    %51 = tpu.matmul %50, %48, %cst_66 {dimension_numbers = #tpu.dot_dimension_numbers<[1], [0], [0], [1], [0, 0, 1, 1], [], []>} : vector<32x16xf32>, vector<16x16xf32>, vector<32x16xf32> -> vector<32x16xf32>
    %c2_67 = arith.constant 2 : index
    %c0_68 = arith.constant 0 : index
    %c0_69 = arith.constant 0 : index
    %c0_70 = arith.constant 0 : index
    %52 = vector.load %arg4[%c2_67, %c0_68, %c0_69, %c0_70] : memref<4x3x16x256xf32, #tpu.memory_space<vmem>>, vector<1x1x16x256xf32>
    %53 = vector.shape_cast %52 : vector<1x1x16x256xf32> to vector<16x256xf32>
    %cst_71 = arith.constant dense<0.000000e+00> : vector<32x256xf32>
    %54 = tpu.matmul %51, %53, %cst_71 {dimension_numbers = #tpu.dot_dimension_numbers<[1], [0], [0], [1], [0, 0, 1, 1], [], []>} : vector<32x16xf32>, vector<16x256xf32>, vector<32x256xf32> -> vector<32x256xf32>
    %55 = arith.addf %46, %54 : vector<32x256xf32>
    %c1_72 = arith.constant 1 : index
    %c0_73 = arith.constant 0 : index
    %c0_74 = arith.constant 0 : index
    %56 = vector.load %arg3[%c1_72, %c0_73, %c0_74] : memref<3x32x16xf32, #tpu.memory_space<vmem>>, vector<1x32x16xf32>
    %57 = vector.shape_cast %56 : vector<1x32x16xf32> to vector<32x16xf32>
    %cst_75 = arith.constant dense<0.000000e+00> : vector<32x16xf32>
    %58 = tpu.matmul %57, %48, %cst_75 {dimension_numbers = #tpu.dot_dimension_numbers<[1], [0], [0], [1], [0, 0, 1, 1], [], []>} : vector<32x16xf32>, vector<16x16xf32>, vector<32x16xf32> -> vector<32x16xf32>
    %c2_76 = arith.constant 2 : index
    %c1_77 = arith.constant 1 : index
    %c0_78 = arith.constant 0 : index
    %c0_79 = arith.constant 0 : index
    %59 = vector.load %arg4[%c2_76, %c1_77, %c0_78, %c0_79] : memref<4x3x16x256xf32, #tpu.memory_space<vmem>>, vector<1x1x16x256xf32>
    %60 = vector.shape_cast %59 : vector<1x1x16x256xf32> to vector<16x256xf32>
    %cst_80 = arith.constant dense<0.000000e+00> : vector<32x256xf32>
    %61 = tpu.matmul %58, %60, %cst_80 {dimension_numbers = #tpu.dot_dimension_numbers<[1], [0], [0], [1], [0, 0, 1, 1], [], []>} : vector<32x16xf32>, vector<16x256xf32>, vector<32x256xf32> -> vector<32x256xf32>
    %62 = arith.addf %55, %61 : vector<32x256xf32>
    %c2_81 = arith.constant 2 : index
    %c0_82 = arith.constant 0 : index
    %c0_83 = arith.constant 0 : index
    %63 = vector.load %arg3[%c2_81, %c0_82, %c0_83] : memref<3x32x16xf32, #tpu.memory_space<vmem>>, vector<1x32x16xf32>
    %64 = vector.shape_cast %63 : vector<1x32x16xf32> to vector<32x16xf32>
    %cst_84 = arith.constant dense<0.000000e+00> : vector<32x16xf32>
    %65 = tpu.matmul %64, %48, %cst_84 {dimension_numbers = #tpu.dot_dimension_numbers<[1], [0], [0], [1], [0, 0, 1, 1], [], []>} : vector<32x16xf32>, vector<16x16xf32>, vector<32x16xf32> -> vector<32x16xf32>
    %c2_85 = arith.constant 2 : index
    %c2_86 = arith.constant 2 : index
    %c0_87 = arith.constant 0 : index
    %c0_88 = arith.constant 0 : index
    %66 = vector.load %arg4[%c2_85, %c2_86, %c0_87, %c0_88] : memref<4x3x16x256xf32, #tpu.memory_space<vmem>>, vector<1x1x16x256xf32>
    %67 = vector.shape_cast %66 : vector<1x1x16x256xf32> to vector<16x256xf32>
    %cst_89 = arith.constant dense<0.000000e+00> : vector<32x256xf32>
    %68 = tpu.matmul %65, %67, %cst_89 {dimension_numbers = #tpu.dot_dimension_numbers<[1], [0], [0], [1], [0, 0, 1, 1], [], []>} : vector<32x16xf32>, vector<16x256xf32>, vector<32x256xf32> -> vector<32x256xf32>
    %69 = arith.addf %62, %68 : vector<32x256xf32>
    %c0_90 = arith.constant 0 : index
    %c3 = arith.constant 3 : index
    %c0_91 = arith.constant 0 : index
    %c0_92 = arith.constant 0 : index
    %70 = vector.load %arg2[%c0_90, %c3, %c0_91, %c0_92] : memref<1x4x16x16xf32, #tpu.memory_space<vmem>>, vector<1x1x16x16xf32>
    %71 = vector.shape_cast %70 : vector<1x1x16x16xf32> to vector<16x16xf32>
    %c0_93 = arith.constant 0 : index
    %c0_94 = arith.constant 0 : index
    %c0_95 = arith.constant 0 : index
    %72 = vector.load %arg3[%c0_93, %c0_94, %c0_95] : memref<3x32x16xf32, #tpu.memory_space<vmem>>, vector<1x32x16xf32>
    %73 = vector.shape_cast %72 : vector<1x32x16xf32> to vector<32x16xf32>
    %cst_96 = arith.constant dense<0.000000e+00> : vector<32x16xf32>
    %74 = tpu.matmul %73, %71, %cst_96 {dimension_numbers = #tpu.dot_dimension_numbers<[1], [0], [0], [1], [0, 0, 1, 1], [], []>} : vector<32x16xf32>, vector<16x16xf32>, vector<32x16xf32> -> vector<32x16xf32>
    %c3_97 = arith.constant 3 : index
    %c0_98 = arith.constant 0 : index
    %c0_99 = arith.constant 0 : index
    %c0_100 = arith.constant 0 : index
    %75 = vector.load %arg4[%c3_97, %c0_98, %c0_99, %c0_100] : memref<4x3x16x256xf32, #tpu.memory_space<vmem>>, vector<1x1x16x256xf32>
    %76 = vector.shape_cast %75 : vector<1x1x16x256xf32> to vector<16x256xf32>
    %cst_101 = arith.constant dense<0.000000e+00> : vector<32x256xf32>
    %77 = tpu.matmul %74, %76, %cst_101 {dimension_numbers = #tpu.dot_dimension_numbers<[1], [0], [0], [1], [0, 0, 1, 1], [], []>} : vector<32x16xf32>, vector<16x256xf32>, vector<32x256xf32> -> vector<32x256xf32>
    %78 = arith.addf %69, %77 : vector<32x256xf32>
    %c1_102 = arith.constant 1 : index
    %c0_103 = arith.constant 0 : index
    %c0_104 = arith.constant 0 : index
    %79 = vector.load %arg3[%c1_102, %c0_103, %c0_104] : memref<3x32x16xf32, #tpu.memory_space<vmem>>, vector<1x32x16xf32>
    %80 = vector.shape_cast %79 : vector<1x32x16xf32> to vector<32x16xf32>
    %cst_105 = arith.constant dense<0.000000e+00> : vector<32x16xf32>
    %81 = tpu.matmul %80, %71, %cst_105 {dimension_numbers = #tpu.dot_dimension_numbers<[1], [0], [0], [1], [0, 0, 1, 1], [], []>} : vector<32x16xf32>, vector<16x16xf32>, vector<32x16xf32> -> vector<32x16xf32>
    %c3_106 = arith.constant 3 : index
    %c1_107 = arith.constant 1 : index
    %c0_108 = arith.constant 0 : index
    %c0_109 = arith.constant 0 : index
    %82 = vector.load %arg4[%c3_106, %c1_107, %c0_108, %c0_109] : memref<4x3x16x256xf32, #tpu.memory_space<vmem>>, vector<1x1x16x256xf32>
    %83 = vector.shape_cast %82 : vector<1x1x16x256xf32> to vector<16x256xf32>
    %cst_110 = arith.constant dense<0.000000e+00> : vector<32x256xf32>
    %84 = tpu.matmul %81, %83, %cst_110 {dimension_numbers = #tpu.dot_dimension_numbers<[1], [0], [0], [1], [0, 0, 1, 1], [], []>} : vector<32x16xf32>, vector<16x256xf32>, vector<32x256xf32> -> vector<32x256xf32>
    %85 = arith.addf %78, %84 : vector<32x256xf32>
    %c2_111 = arith.constant 2 : index
    %c0_112 = arith.constant 0 : index
    %c0_113 = arith.constant 0 : index
    %86 = vector.load %arg3[%c2_111, %c0_112, %c0_113] : memref<3x32x16xf32, #tpu.memory_space<vmem>>, vector<1x32x16xf32>
    %87 = vector.shape_cast %86 : vector<1x32x16xf32> to vector<32x16xf32>
    %cst_114 = arith.constant dense<0.000000e+00> : vector<32x16xf32>
    %88 = tpu.matmul %87, %71, %cst_114 {dimension_numbers = #tpu.dot_dimension_numbers<[1], [0], [0], [1], [0, 0, 1, 1], [], []>} : vector<32x16xf32>, vector<16x16xf32>, vector<32x16xf32> -> vector<32x16xf32>
    %c3_115 = arith.constant 3 : index
    %c2_116 = arith.constant 2 : index
    %c0_117 = arith.constant 0 : index
    %c0_118 = arith.constant 0 : index
    %89 = vector.load %arg4[%c3_115, %c2_116, %c0_117, %c0_118] : memref<4x3x16x256xf32, #tpu.memory_space<vmem>>, vector<1x1x16x256xf32>
    %90 = vector.shape_cast %89 : vector<1x1x16x256xf32> to vector<16x256xf32>
    %cst_119 = arith.constant dense<0.000000e+00> : vector<32x256xf32>
    %91 = tpu.matmul %88, %90, %cst_119 {dimension_numbers = #tpu.dot_dimension_numbers<[1], [0], [0], [1], [0, 0, 1, 1], [], []>} : vector<32x16xf32>, vector<16x256xf32>, vector<32x256xf32> -> vector<32x256xf32>
    %92 = arith.addf %85, %91 : vector<32x256xf32>
    %c0_120 = arith.constant 0 : index
    %c0_121 = arith.constant 0 : index
    %93 = vector.load %arg5[%c0_120, %c0_121] : memref<1x256xf32, #tpu.memory_space<vmem>>, vector<1x256xf32>
    %94 = vector.shape_cast %93 : vector<1x256xf32> to vector<256xf32>
    %95 = vector.shape_cast %94 : vector<256xf32> to vector<1x256xf32>
    %96 = vector.broadcast %95 : vector<1x256xf32> to vector<32x256xf32>
    %97 = arith.addf %92, %96 : vector<32x256xf32>
    %c0_122 = arith.constant 0 : index
    %c0_123 = arith.constant 0 : index
    %c0_124 = arith.constant 0 : index
    %98 = vector.load %arg6[%c0_122, %c0_123, %c0_124] : memref<1x32x256xf32, #tpu.memory_space<vmem>>, vector<1x32x256xf32>
    %99 = vector.shape_cast %98 : vector<1x32x256xf32> to vector<32x256xf32>
    %100 = vector.shape_cast %97 : vector<32x256xf32> to vector<1x32x256xf32>
    tpu.vector_store %arg6[%c0_122, %c0_123, %c0_124], %100 {strides = array<i32>} : memref<1x32x256xf32, #tpu.memory_space<vmem>>, vector<1x32x256xf32>,
    return
  }
  func.func @transform_0(%arg0: i32, %arg1: i32) -> (i32, i32, i32, i32) {
    %c0_i32 = arith.constant 0 : i32
    %c0_i32_0 = arith.constant 0 : i32
    %c0_i32_1 = arith.constant 0 : i32
    %c0_i32_2 = arith.constant 0 : i32
    return %arg0, %c0_i32, %c0_i32_0, %c0_i32_1 : i32, i32, i32, i32
  }
  func.func @transform_1(%arg0: i32, %arg1: i32) -> (i32, i32, i32) {
    %c0_i32 = arith.constant 0 : i32
    %c0_i32_0 = arith.constant 0 : i32
    %c0_i32_1 = arith.constant 0 : i32
    return %c0_i32, %arg1, %c0_i32_0 : i32, i32, i32
  }
  func.func @transform_2(%arg0: i32, %arg1: i32) -> (i32, i32, i32, i32) {
    %c0_i32 = arith.constant 0 : i32
    %c0_i32_0 = arith.constant 0 : i32
    %c0_i32_1 = arith.constant 0 : i32
    %c0_i32_2 = arith.constant 0 : i32
    %c0_i32_3 = arith.constant 0 : i32
    return %c0_i32, %c0_i32_0, %c0_i32_1, %c0_i32_2 : i32, i32, i32, i32
  }
  func.func @transform_3(%arg0: i32, %arg1: i32) -> (i32, i32) {
    %c0_i32 = arith.constant 0 : i32
    %c0_i32_0 = arith.constant 0 : i32
    %c0_i32_1 = arith.constant 0 : i32
    return %c0_i32, %c0_i32_0 : i32, i32
  }
  func.func @transform_4(%arg0: i32, %arg1: i32) -> (i32, i32, i32) {
    %c0_i32 = arith.constant 0 : i32
    %c0_i32_0 = arith.constant 0 : i32
    return %arg0, %arg1, %c0_i32 : i32, i32, i32
  }
}

</mosaic_0001>

<bundles_post_ra>
// kernel: upsample_block_forward.1
= control target key start
LH: loop header
LB: loop body
LE: loop exit
PB: predicated region body
PF: predicated region fallthrough
CT: control target
= control target key end

     0   :  { %s3427_s15 = smov 0   ;;  %s3429_s16 = smov 0   ;;  %s3915_s0 = inlined_call_operand.vmem [shape: f32[2,4,16,16], index: 0, kind: input, shape index: {}]   ;;  %s3916_s1 = inlined_call_operand.vmem [shape: f32[3,32,16], index: 1, kind: input, shape index: {}]   ;;  %s3917_s2 = inlined_call_operand.vmem [shape: f32[4,3,16,256], index: 2, kind: input, shape index: {}]   ;;  %s3918_s3 = inlined_call_operand.vmem [shape: f32[1,256], index: 3, kind: input, shape index: {}]   ;;  %s3919_s4 = inlined_call_operand.vmem [shape: f32[2,32,256], index: 4, kind: output, shape index: {}]  }
   0x1   :  { %s3431_s17 = smov 0  }
   0x2 LB: > { %s26_s18 = sadd.s32 1, %s3395_s16  ;;  %p2813_p0 = scmp.ge.s32.totalorder %s3399_s17, 1  ;;  %s3399_s17 = sphi %s3431_s17, %s14_s17   ;;  %s3395_s16 = sphi %s3429_s16, %s3921_s16   ;;  %s3391_s15 = sphi %s3427_s15, %s3920_s15  }
   0x3   : > { %p28_p1 = scmp.ge.s32.totalorder %s26_s18, 2  ;;  %p187_p2 = scmp.lt.s32.totalorder %s3399_s17, 3 }
   0x5   : > { %s3923_s18 = smov (%p28_p1, %s26_s18), 0  ;;  %p188_p3 = pnand %p2813_p0, %p187_p2 }
   0x6   : > { %p223_p4 = scmp.lt.s32.totalorder (!%p188_p3), %s3391_s15, 1  ;;  %v3448_v0 = vld [vmem:[%s3916_s1] sm:$0xff] (!%p188_p3)  ;;  %vm251_vm0 = vcmask (!%p188_p3), 130048   ;;  %v3467_v4 = vld [vmem:[%s3916_s1 + $0x8] sm:$0xff] (!%p188_p3)  ;;  %v3472_v5 = vld [vmem:[%s3916_s1 + $0x10] sm:$0xff] (!%p188_p3)  ;;  %v3401_v17 = vmov (!%p188_p3), 0.0  }
   0x7   : > { %191 = sbr.rel (%p188_p3) target bundleno = 1077 (0x435), region = 36  ;;  %3052 = vmatprep.mubr.msk.f32.mxu1 (!%p188_p3), %vm251_vm0, %v3448_v0  ;;  %v3481_v6 = vld [vmem:[%s3916_s1 + $0x18] sm:$0xff] (!%p188_p3)  ;;  %v3486_v7 = vld [vmem:[%s3916_s1 + $0x20] sm:$0xff] (!%p188_p3)  ;;  %v3495_v8 = vld [vmem:[%s3916_s1 + $0x28] sm:$0xff] (!%p188_p3)  ;;  %1047 = vmatprep.mubr.f32.mxu0 (!%p188_p3), %v3401_v17 }
   0x8   : > { %v3500_v9 = vld [vmem:[%s3916_s1 + $0x30] sm:$0xff] (!%p188_p3)  ;;  %v3509_v10 = vld [vmem:[%s3916_s1 + $0x38] sm:$0xff] (!%p188_p3)  ;;  %v2831_v11 = vld [vmem:[%s3917_s2 + $0x28] sm:$0xff] (!%p188_p3) }
   0x9   : > { %v2833_v12 = vld [vmem:[%s3917_s2 + $0x38] sm:$0xff] (!%p188_p3)  ;;  %v2830_v13 = vld [vmem:[%s3917_s2 + $0x20] sm:$0xff] (!%p188_p3)  ;;  %v2832_v15 = vld [vmem:[%s3917_s2 + $0x30] sm:$0xff] (!%p188_p3) }
   0xa   : > { %v3176_v14 = vpack.c.bf16 (!%p188_p3), %v2833_v12, %v2831_v11  ;;  %v3178_v16 = vpack.c.bf16 (!%p188_p3), %v2832_v15, %v2830_v13  ;;  %v350_v18 = vld [vmem:[%s3917_s2 + $0x8] sm:$0xff] (!%p188_p3)  ;;  %v352_v19 = vld [vmem:[%s3917_s2 + $0x18] sm:$0xff] (!%p188_p3)  ;;  %v349_v24 = vld [vmem:[%s3917_s2] sm:$0xff] (!%p188_p3) }
   0xb   : > { %v3180_v20 = vpack.c.bf16 (!%p188_p3), %v352_v19, %v350_v18  ;;  %v351_v25 = vld [vmem:[%s3917_s2 + $0x10] sm:$0xff] (!%p188_p3)  ;;  %v2851_v32 = vld [vmem:[%s3917_s2 + $0x48] sm:$0xff] (!%p188_p3)  ;;  %v2853_v33 = vld [vmem:[%s3917_s2 + $0x58] sm:$0xff] (!%p188_p3) }
   0xc   : > { %v3182_v27 = vpack.c.bf16 (!%p188_p3), %v351_v25, %v349_v24  ;;  %v3188_v34 = vpack.c.bf16 (!%p188_p3), %v2853_v33, %v2851_v32  ;;  %v3562_v35 = vld [vmem:[%s3916_s1 + $0x40] sm:$0xff] (!%p188_p3)  ;;  %v2852_v37 = vld [vmem:[%s3917_s2 + $0x50] sm:$0xff] (!%p188_p3)  ;;  %v3576_v38 = vld [vmem:[%s3916_s1 + $0x48] sm:$0xff] (!%p188_p3) }
   0xd   : > { %v2850_v36 = vld [vmem:[%s3917_s2 + $0x40] sm:$0xff] (!%p188_p3)  ;;  %v3581_v40 = vld [vmem:[%s3916_s1 + $0x50] sm:$0xff] (!%p188_p3)  ;;  %v3590_v41 = vld [vmem:[%s3916_s1 + $0x58] sm:$0xff] (!%p188_p3) }
   0xe   : > { %s3925_s15 = smov (!%p223_p4, %s3391_s15), 1  ;;  %v3190_v39 = vpack.c.bf16 %v2852_v37, %v2850_v36  ;;  %v2865_v55 = vld [vmem:[%s3917_s2 + $0x68] sm:$0xff]  ;;  %v2867_v56 = vld [vmem:[%s3917_s2 + $0x78] sm:$0xff]  ;;  %v2864_v58 = vld [vmem:[%s3917_s2 + $0x60] sm:$0xff] }
   0xf   : > { %s2974_s21 = sshll.u32 %s3925_s15, 6  ;;  %v3196_v57 = vpack.c.bf16 %v2867_v56, %v2865_v55  ;;  %v2866_v59 = vld [vmem:[%s3917_s2 + $0x70] sm:$0xff]  ;;  %v2877_v61 = vld [vmem:[%s3917_s2 + $0x88] sm:$0xff]  ;;  %v2879_v62 = vld [vmem:[%s3917_s2 + $0x98] sm:$0xff] }
  0x10   : > { %s3460_s24 = scalar_lea.vmem %s3915_s0, %s2974_s21  ;;  %v3198_v60 = vpack.c.bf16 %v2866_v59, %v2864_v58  ;;  %v3204_v63 = vpack.c.bf16 %v2879_v62, %v2877_v61  ;;  %v2891_v11 = vld [vmem:[%s3917_s2 + $0xb8] sm:$0xff]  ;;  %v2903_v25 = vld [vmem:[%s3917_s2 + $0xc8] sm:$0xff]  ;;  %v2904_v36 = vld [vmem:[%s3917_s2 + $0xd0] sm:$0xff]  ;;  %s243_s22 = scalar_lea.vmem %s3919_s4, %s2974_s21 }
  0x11   : > { %v245_v1 = vld [vmem:[%s3460_s24] sm:$0xff]  ;;  %v246_v2 = vld [vmem:[%s3460_s24 + $0x8] sm:$0xff]  ;;  %v2858_v42 = vld [vmem:[%s3460_s24 + $0x10] sm:$0xff]  ;;  %3197 = vmatprep.subr.bf16.mxu0 %v3196_v57 }
  0x12   : > { %v3168_v3 = vpack.c.bf16 %v246_v2, %v245_v1  ;;  %v2859_v43 = vld [vmem:[%s3460_s24 + $0x18] sm:$0xff]  ;;  %v2896_v49 = vld [vmem:[%s3460_s24 + $0x20] sm:$0xff]  ;;  %v2897_v50 = vld [vmem:[%s3460_s24 + $0x28] sm:$0xff]  ;;  %3199 = vmatpush1.bf16.msra.mxu0 %v3198_v60 }
  0x13   : > { %v3192_v44 = vpack.c.bf16 %v2859_v43, %v2858_v42  ;;  %v3216_v51 = vpack.c.bf16 %v2897_v50, %v2896_v49  ;;  %v2934_v52 = vld [vmem:[%s3460_s24 + $0x30] sm:$0xff]  ;;  %v2935_v53 = vld [vmem:[%s3460_s24 + $0x38] sm:$0xff]  ;;  %3205 = vmatprep.subr.bf16.mxu0 %v3204_v63  ;;  %v2914_v49 = vld [vmem:[%s3917_s2 + $0xe0] sm:$0xff] }
  0x14   : > { %3169 = vmatprep.subr.bf16.mxu1 %v3168_v3  ;;  %v3240_v54 = vpack.c.bf16 %v2935_v53, %v2934_v52  ;;  %v2916_v50 = vld [vmem:[%s3917_s2 + $0xf0] sm:$0xff]  ;;  %v2927_v52 = vld [vmem:[%s3917_s2 + $0x108] sm:$0xff]  ;;  %v2929_v53 = vld [vmem:[%s3917_s2 + $0x118] sm:$0xff] }
  0x15   : > { %3171 = vmatpush3.bf16.msra.mxu1 %v3168_v3  ;;  %v3230_v55 = vpack.c.bf16 %v2916_v50, %v2914_v49  ;;  %v3236_v56 = vpack.c.bf16 %v2929_v53, %v2927_v52  ;;  %v2926_v63 = vld [vmem:[%s3917_s2 + $0x100] sm:$0xff] }
  0x16   : > { %3173 = vmatprep.subr.bf16.mxu1 %v3168_v3 }
  0x18   : > { %3053 = vmatmul.mubr.msk.f32.vlgmr.msra.gmra.mrb[0].mxu1 %vm251_vm0, %v3467_v4 }
  0x19   : > { %3175 = vmatpush3.bf16.msra.mxu1 %v3168_v3  ;;  %3055 = vmatprep.mubr.msk.f32.mxu1 %vm251_vm0, %v3472_v5 }
  0x1a   : > { %3177 = vmatprep.subr.bf16.mxu1 %v3176_v14 }
  0x1c   : > { %3056 = vmatmul.mubr.msk.f32.gmra.mrb[2].mxu1 %vm251_vm0, %v3481_v6 }
  0x1d   : > { %3062 = vmatprep.mubr.msk.f32.mxu1 %vm251_vm0, %v3486_v7 }
  0x20   : > { %3063 = vmatmul.mubr.msk.f32.vlgmr.msra.gmra.mrb[4].mxu1 %vm251_vm0, %v3495_v8 }
  0x21   : > { %3065 = vmatprep.mubr.msk.f32.mxu1 %vm251_vm0, %v3500_v9  ;;  %3179 = vmatpush1.bf16.msra.mxu1 %v3178_v16 }
  0x22   : > { %3181 = vmatprep.subr.bf16.mxu1 %v3180_v20 }
  0x24   : > { %3066 = vmatmul.mubr.msk.f32.gmra.mrb[6].mxu1 %vm251_vm0, %v3509_v10 }
  0x25   : > { %536 = vmatprep.mubr.f32.mxu1 %v3401_v17 }
  0xeb   : > { %v3054_v21 = vpop.f32.mrb[0].mxu1 }
  0xec   : > { %v330_v22 = vpop.f32.mrb[1].mxu1 }
  0xef   : > { %v3057_v23 = vpop.f32.mrb[2].mxu1 }
  0xf0   : > { %v340_v26 = vpop.f32.mrb[3].mxu1 }
  0xf3   : > { %v3064_v28 = vpop.f32.mrb[4].mxu1 }
  0xf4   : > { %v436_v29 = vpop.f32.mrb[5].mxu1 }
  0xf5   : > { %2834 = vmatmul.mubr.msk.f32.vlgmr.msra.gmra.mrb[8].mxu1 %vm251_vm0, %v436_v29 }
  0xf6   : > { %3183 = vmatpush1.bf16.msra.mxu1 %v3182_v27  ;;  %542 = vmatprep.mubr.f32.mxu1 %v3401_v17 }
  0xf7   : > { %v3067_v30 = vpop.f32.mrb[6].mxu1  ;;  %3185 = vmatprep.subr.bf16.mxu1 %v3168_v3 }
  0xf8   : > { %v446_v31 = vpop.f32.mrb[7].mxu1 }
  0xf9   : > { %2835 = vmatmul.mubr.msk.f32.gmra.mrb[10].mxu1 %vm251_vm0, %v3064_v28 }
  0xfa   : > { %548 = vmatprep.mubr.f32.mxu1 %v3401_v17 }
  0xfd   : > { %2836 = vmatmul.mubr.msk.f32.gmra.mrb[12].mxu1 %vm251_vm0, %v446_v31 }
  0xfe   : > { %554 = vmatprep.mubr.f32.mxu1 %v3401_v17 }
 0x101   : > { %2837 = vmatmul.mubr.msk.f32.gmra.mrb[14].mxu1 %vm251_vm0, %v3067_v30 }
 0x102   : > { %637 = vmatprep.mubr.f32.mxu1 %v3401_v17 }
 0x105   : > { %2838 = vmatmul.mubr.msk.f32.vlgmr.msra.gmra.mrb[8].mxu1 %vm251_vm0, %v330_v22  ;;  %v2890_v22 = vld [vmem:[%s3917_s2 + $0xb0] sm:$0xff] }
 0x106   : > { %3187 = vmatpush3.bf16.msra.mxu1 %v3168_v3  ;;  %643 = vmatprep.mubr.f32.mxu1 %v3401_v17 }
 0x107   : > { %3189 = vmatprep.subr.bf16.mxu1 %v3188_v34 }
 0x109   : > { %2839 = vmatmul.mubr.msk.f32.gmra.mrb[10].mxu1 %vm251_vm0, %v3054_v21  ;;  %v2888_v21 = vld [vmem:[%s3917_s2 + $0xa0] sm:$0xff] }
 0x10a   : > { %649 = vmatprep.mubr.f32.mxu1 %v3401_v17  ;;  %v3214_v27 = vpack.c.bf16 %v2890_v22, %v2888_v21  ;;  %v2942_v21 = vld [vmem:[%s3917_s2 + $0x130] sm:$0xff]  ;;  %v2953_v22 = vld [vmem:[%s3917_s2 + $0x148] sm:$0xff] }
 0x10d   : > { %2840 = vmatmul.mubr.msk.f32.gmra.mrb[12].mxu1 %vm251_vm0, %v340_v26  ;;  %v2905_v26 = vld [vmem:[%s3917_s2 + $0xd8] sm:$0xff] }
 0x10e   : > { %655 = vmatprep.mubr.f32.mxu1 %v3401_v17  ;;  %v3220_v29 = vpack.c.bf16 %v2905_v26, %v2903_v25  ;;  %v2952_v26 = vld [vmem:[%s3917_s2 + $0x140] sm:$0xff] }
 0x111   : > { %2841 = vmatmul.mubr.msk.f32.gmra.mrb[14].mxu1 %vm251_vm0, %v3057_v23 }
 0x112   : > { %3072 = vmatprep.mubr.msk.f32.mxu1 %vm251_vm0, %v3562_v35 }
 0x115   : > { %3073 = vmatmul.mubr.msk.f32.vlgmr.msra.gmra.mrb[16].mxu1 %vm251_vm0, %v3576_v38 }
 0x116   : > { %3075 = vmatprep.mubr.msk.f32.mxu1 %vm251_vm0, %v3581_v40  ;;  %3191 = vmatpush1.bf16.msra.mxu1 %v3190_v39  ;;  %v2917_v39 = vld [vmem:[%s3917_s2 + $0xf8] sm:$0xff] }
 0x117   : > { %3193 = vmatprep.subr.bf16.mxu1 %v3192_v44 }
 0x119   : > { %3076 = vmatmul.mubr.msk.f32.gmra.mrb[18].mxu1 %vm251_vm0, %v3590_v41 }
 0x11a   : > { %845 = vmatprep.mubr.f32.mxu1 %v3401_v17 }
 0x1e8   : > { %v3074_v45 = vpop.f32.mrb[16].mxu1 }
 0x1e9   : > { %v745_v46 = vpop.f32.mrb[17].mxu1 }
 0x1ea   : > { %2854 = vmatmul.mubr.msk.f32.vlgmr.msra.gmra.mrb[8].mxu1 %vm251_vm0, %v745_v46 }
 0x1eb   : > { %3195 = vmatpush3.bf16.msra.mxu1 %v3192_v44  ;;  %851 = vmatprep.mubr.f32.mxu1 %v3401_v17 }
 0x1ec   : > { %v3077_v47 = vpop.f32.mrb[18].mxu1  ;;  %3201 = vmatprep.subr.bf16.mxu1 %v3192_v44 }
 0x1ed   : > { %v755_v48 = vpop.f32.mrb[19].mxu1 }
 0x1ee   : > { %2855 = vmatmul.mubr.msk.f32.gmra.mrb[10].mxu1 %vm251_vm0, %v3074_v45 }
 0x1ef   : > { %857 = vmatprep.mubr.f32.mxu1 %v3401_v17 }
 0x1f2   : > { %2856 = vmatmul.mubr.msk.f32.gmra.mrb[12].mxu1 %vm251_vm0, %v755_v48 }
 0x1f3   : > { %863 = vmatprep.mubr.f32.mxu1 %v3401_v17 }
 0x1f6   : > { %2857 = vmatmul.mubr.msk.f32.gmra.mrb[14].mxu1 %vm251_vm0, %v3077_v47 }
 0x1f7   : > { %3082 = vmatprep.mubr.msk.f32.mxu1 %vm251_vm0, %v3448_v0 }
 0x1fa   : > { %3083 = vmatmul.mubr.msk.f32.vlgmr.msra.gmra.mrb[20].mxu1 %vm251_vm0, %v3467_v4 }
 0x1fb   : > { %3085 = vmatprep.mubr.msk.f32.mxu1 %vm251_vm0, %v3472_v5  ;;  %3203 = vmatpush3.bf16.msra.mxu1 %v3192_v44 }
 0x1fc   : > { %3209 = vmatprep.subr.bf16.mxu1 %v3192_v44 }
 0x1fe   : > { %3086 = vmatmul.mubr.msk.f32.gmra.mrb[22].mxu1 %vm251_vm0, %v3481_v6 }
 0x1ff   : > { %3092 = vmatprep.mubr.msk.f32.mxu1 %vm251_vm0, %v3486_v7 }
 0x202   : > { %3093 = vmatmul.mubr.msk.f32.vlgmr.msra.gmra.mrb[24].mxu1 %vm251_vm0, %v3495_v8 }
 0x203   : > { %3095 = vmatprep.mubr.msk.f32.mxu1 %vm251_vm0, %v3500_v9  ;;  %3211 = vmatpush3.bf16.msra.mxu1 %v3192_v44 }
 0x204   : > { %3217 = vmatprep.subr.bf16.mxu1 %v3216_v51 }
 0x206   : > { %3096 = vmatmul.mubr.msk.f32.gmra.mrb[26].mxu1 %vm251_vm0, %v3509_v10 }
 0x207   : > { %3102 = vmatprep.mubr.msk.f32.mxu1 %vm251_vm0, %v3562_v35 }
 0x20a   : > { %3103 = vmatmul.mubr.msk.f32.vlgmr.msra.gmra.mrb[28].mxu1 %vm251_vm0, %v3576_v38 }
 0x20b   : > { %3105 = vmatprep.mubr.msk.f32.mxu1 %vm251_vm0, %v3581_v40  ;;  %3219 = vmatpush3.bf16.msra.mxu1 %v3216_v51 }
 0x20c   : > { %3225 = vmatprep.subr.bf16.mxu1 %v3216_v51 }
 0x20e   : > { %3106 = vmatmul.mubr.msk.f32.gmra.mrb[30].mxu1 %vm251_vm0, %v3590_v41 }
 0x20f   : > { %3112 = vmatprep.mubr.msk.f32.mxu1 %vm251_vm0, %v3448_v0 }
 0x212   : > { %3113 = vmatmul.mubr.msk.f32.vlgmr.msra.gmra.mrb[32].mxu1 %vm251_vm0, %v3467_v4 }
 0x213   : > { %3115 = vmatprep.mubr.msk.f32.mxu1 %vm251_vm0, %v3472_v5  ;;  %3227 = vmatpush3.bf16.msra.mxu1 %v3216_v51 }
 0x214   : > { %3233 = vmatprep.subr.bf16.mxu1 %v3216_v51 }
 0x216   : > { %3116 = vmatmul.mubr.msk.f32.gmra.mrb[34].mxu1 %vm251_vm0, %v3481_v6 }
 0x217   : > { %3122 = vmatprep.mubr.msk.f32.mxu1 %vm251_vm0, %v3486_v7 }
 0x21a   : > { %3123 = vmatmul.mubr.msk.f32.vlgmr.msra.gmra.mrb[36].mxu1 %vm251_vm0, %v3495_v8 }
 0x21b   : > { %3125 = vmatprep.mubr.msk.f32.mxu1 %vm251_vm0, %v3500_v9  ;;  %3235 = vmatpush3.bf16.msra.mxu1 %v3216_v51 }
 0x21c   : > { %3241 = vmatprep.subr.bf16.mxu1 %v3240_v54 }
 0x21e   : > { %3126 = vmatmul.mubr.msk.f32.gmra.mrb[38].mxu1 %vm251_vm0, %v3509_v10 }
 0x21f   : > { %3132 = vmatprep.mubr.msk.f32.mxu1 %vm251_vm0, %v3562_v35 }
 0x222   : > { %3133 = vmatmul.mubr.msk.f32.vlgmr.msra.gmra.mrb[40].mxu1 %vm251_vm0, %v3576_v38 }
 0x223   : > { %3135 = vmatprep.mubr.msk.f32.mxu1 %vm251_vm0, %v3581_v40  ;;  %3243 = vmatpush3.bf16.msra.mxu1 %v3240_v54 }
 0x224   : > { %3249 = vmatprep.subr.bf16.mxu1 %v3240_v54 }
 0x226   : > { %3136 = vmatmul.mubr.msk.f32.gmra.mrb[42].mxu1 %vm251_vm0, %v3590_v41 }
 0x227   : > { %3142 = vmatprep.mubr.msk.f32.mxu1 %vm251_vm0, %v3448_v0 }
 0x22a   : > { %3143 = vmatmul.mubr.msk.f32.vlgmr.msra.gmra.mrb[44].mxu1 %vm251_vm0, %v3467_v4 }
 0x22b   : > { %3145 = vmatprep.mubr.msk.f32.mxu1 %vm251_vm0, %v3472_v5  ;;  %3251 = vmatpush3.bf16.msra.mxu1 %v3240_v54 }
 0x22c   : > { %3257 = vmatprep.subr.bf16.mxu1 %v3240_v54 }
 0x22e   : > { %3146 = vmatmul.mubr.msk.f32.gmra.mrb[46].mxu1 %vm251_vm0, %v3481_v6 }
 0x22f   : > { %3152 = vmatprep.mubr.msk.f32.mxu1 %vm251_vm0, %v3486_v7  ;;  %v2876_v7 = vld [vmem:[%s3917_s2 + $0x80] sm:$0xff] }
 0x232   : > { %3153 = vmatmul.mubr.msk.f32.vlgmr.msra.gmra.mrb[48].mxu1 %vm251_vm0, %v3495_v8  ;;  %v2878_v8 = vld [vmem:[%s3917_s2 + $0x90] sm:$0xff] }
 0x233   : > { %3155 = vmatprep.mubr.msk.f32.mxu1 %vm251_vm0, %v3500_v9  ;;  %3259 = vmatpush3.bf16.msra.mxu1 %v3240_v54  ;;  %v3206_v12 = vpack.c.bf16 %v2878_v8, %v2876_v7  ;;  %v2928_v7 = vld [vmem:[%s3917_s2 + $0x110] sm:$0xff] }
 0x236   : > { %3156 = vmatmul.mubr.msk.f32.gmra.mrb[50].mxu1 %vm251_vm0, %v3509_v10  ;;  %v2889_v10 = vld [vmem:[%s3917_s2 + $0xa8] sm:$0xff] }
 0x237   : > { %3162 = vmatprep.mubr.msk.f32.mxu1 %vm251_vm0, %v3562_v35  ;;  %v3212_v14 = vpack.c.bf16 %v2891_v11, %v2889_v10  ;;  %v2902_v35 = vld [vmem:[%s3917_s2 + $0xc0] sm:$0xff]  ;;  %v2941_v10 = vld [vmem:[%s3917_s2 + $0x128] sm:$0xff]  ;;  %v2943_v11 = vld [vmem:[%s3917_s2 + $0x138] sm:$0xff] }
 0x23a   : > { %3163 = vmatmul.mubr.msk.f32.vlgmr.msra.gmra.mrb[52].mxu1 %vm251_vm0, %v3576_v38  ;;  %v2915_v38 = vld [vmem:[%s3917_s2 + $0xe8] sm:$0xff] }
 0x23b   : > { %3165 = vmatprep.mubr.msk.f32.mxu1 %vm251_vm0, %v3581_v40  ;;  %v3228_v42 = vpack.c.bf16 %v2917_v39, %v2915_v38  ;;  %v2678_v38 = vld [vmem:[%s3918_s3] sm:$0x3] }
 0x23e   : > { %3166 = vmatmul.mubr.msk.f32.gmra.mrb[54].mxu1 %vm251_vm0, %v3590_v41  ;;  %v3222_v41 = vpack.c.bf16 %v2904_v36, %v2902_v35  ;;  %v2680_v35 = vlaneseq }
 0x240   : > { %v2681_v36 = vshrl.u32 %v2680_v35, 7 }
 0x242   : > { %v2686_v39 = vsub.s32 1, %v2681_v36 }
 0x2bd   : > { %v3698_v0 = vpop.f32.mrb[8].mxu1 }
 0x2be   : > { %v3700_v1 = vpop.f32.mrb[9].mxu1 }
 0x2c1   : > { %v3702_v2 = vpop.f32.mrb[10].mxu1 }
 0x2c2   : > { %v3704_v3 = vpop.f32.mrb[11].mxu1 }
 0x2c5   : > { %v3706_v4 = vpop.f32.mrb[12].mxu1 }
 0x2c6   : > { %v3708_v5 = vpop.f32.mrb[13].mxu1 }
 0x2c9   : > { %v3710_v6 = vpop.f32.mrb[14].mxu1 }
 0x2ca   : > { %v3718_v9 = vpop.f32.mrb[15].mxu1 }
 0x2cd   : > { %v3084_v13 = vpop.f32.mrb[20].mxu1 }
 0x2ce   : > { %v947_v15 = vpop.f32.mrb[21].mxu1 }
 0x2cf   : > { %2868 = vmatmul.mubr.msk.f32.vlgmr.msra.gmra.mrb[0].mxu0 %vm251_vm0, %v947_v15 }
 0x2d0   : > { %3207 = vmatpush1.bf16.msra.mxu0 %v3206_v12  ;;  %1053 = vmatprep.mubr.f32.mxu0 %v3401_v17 }
 0x2d1   : > { %v3087_v16 = vpop.f32.mrb[22].mxu1  ;;  %3213 = vmatprep.subr.bf16.mxu0 %v3212_v14  ;;  %v3244_v14 = vpack.c.bf16 %v2943_v11, %v2941_v10 }
 0x2d2   : > { %v957_v18 = vpop.f32.mrb[23].mxu1 }
 0x2d3   : > { %2869 = vmatmul.mubr.msk.f32.gmra.mrb[2].mxu0 %vm251_vm0, %v3084_v13  ;;  %v3238_v13 = vpack.c.bf16 %v2928_v7, %v2926_v63 }
 0x2d4   : > { %1059 = vmatprep.mubr.f32.mxu0 %v3401_v17 }
 0x2d5   : > { %v3094_v19 = vpop.f32.mrb[24].mxu1 }
 0x2d6   : > { %v1146_v20 = vpop.f32.mrb[25].mxu1 }
 0x2d7   : > { %2870 = vmatmul.mubr.msk.f32.gmra.mrb[4].mxu0 %vm251_vm0, %v957_v18 }
 0x2d8   : > { %1065 = vmatprep.mubr.f32.mxu0 %v3401_v17 }
 0x2d9   : > { %v3097_v23 = vpop.f32.mrb[26].mxu1 }
 0x2da   : > { %v1156_v24 = vpop.f32.mrb[27].mxu1 }
 0x2db   : > { %2871 = vmatmul.mubr.msk.f32.gmra.mrb[6].mxu0 %vm251_vm0, %v3087_v16 }
 0x2dc   : > { %1246 = vmatprep.mubr.f32.mxu0 %v3401_v17 }
 0x2dd   : > { %v3104_v28 = vpop.f32.mrb[28].mxu1 }
 0x2de   : > { %v1345_v30 = vpop.f32.mrb[29].mxu1 }
 0x2df   : > { %2880 = vmatmul.mubr.msk.f32.vlgmr.msra.gmra.mrb[0].mxu0 %vm251_vm0, %v1146_v20  ;;  %v2940_v20 = vld [vmem:[%s3917_s2 + $0x120] sm:$0xff] }
 0x2e0   : > { %3215 = vmatpush1.bf16.msra.mxu0 %v3214_v27  ;;  %1252 = vmatprep.mubr.f32.mxu0 %v3401_v17  ;;  %v2954_v27 = vld [vmem:[%s3917_s2 + $0x150] sm:$0xff] }
 0x2e1   : > { %3221 = vmatprep.subr.bf16.mxu0 %v3220_v29  ;;  %v3107_v31 = vpop.f32.mrb[30].mxu1  ;;  %v2967_v29 = vld [vmem:[%s3917_s2 + $0x178] sm:$0xff] }
 0x2e2   : > { %v1355_v32 = vpop.f32.mrb[31].mxu1 }
 0x2e3   : > { %2881 = vmatmul.mubr.msk.f32.gmra.mrb[2].mxu0 %vm251_vm0, %v3094_v19 }
 0x2e4   : > { %1258 = vmatprep.mubr.f32.mxu0 %v3401_v17 }
 0x2e5   : > { %v3114_v33 = vpop.f32.mrb[32].mxu1 }
 0x2e6   : > { %v1547_v34 = vpop.f32.mrb[33].mxu1 }
 0x2e7   : > { %2882 = vmatmul.mubr.msk.f32.gmra.mrb[4].mxu0 %vm251_vm0, %v1156_v24  ;;  %v3246_v24 = vpack.c.bf16 %v2942_v21, %v2940_v20 }
 0x2e8   : > { %1264 = vmatprep.mubr.f32.mxu0 %v3401_v17 }
 0x2e9   : > { %v3117_v37 = vpop.f32.mrb[34].mxu1 }
 0x2ea   : > { %v1557_v40 = vpop.f32.mrb[35].mxu1 }
 0x2eb   : > { %2883 = vmatmul.mubr.msk.f32.gmra.mrb[6].mxu0 %vm251_vm0, %v3097_v23  ;;  %v2955_v23 = vld [vmem:[%s3917_s2 + $0x158] sm:$0xff] }
 0x2ec   : > { %1445 = vmatprep.mubr.f32.mxu0 %v3401_v17  ;;  %v3252_v25 = vpack.c.bf16 %v2955_v23, %v2953_v22 }
 0x2ed   : > { %v3124_v43 = vpop.f32.mrb[36].mxu1 }
 0x2ee   : > { %v1746_v44 = vpop.f32.mrb[37].mxu1 }
 0x2ef   : > { %2892 = vmatmul.mubr.msk.f32.vlgmr.msra.gmra.mrb[0].mxu0 %vm251_vm0, %v1345_v30  ;;  %v3254_v30 = vpack.c.bf16 %v2954_v27, %v2952_v26 }
 0x2f0   : > { %3223 = vmatpush1.bf16.msra.mxu0 %v3222_v41  ;;  %1451 = vmatprep.mubr.f32.mxu0 %v3401_v17 }
 0x2f1   : > { %3229 = vmatprep.subr.bf16.mxu0 %v3228_v42  ;;  %v3127_v45 = vpop.f32.mrb[38].mxu1  ;;  %v2687_v42 = vrot.slane %v2678_v38, %v2686_v39 }
 0x2f2   : > { %v1756_v46 = vpop.f32.mrb[39].mxu1 }
 0x2f3   : > { %2893 = vmatmul.mubr.msk.f32.gmra.mrb[2].mxu0 %vm251_vm0, %v3104_v28  ;;  %v2965_v28 = vld [vmem:[%s3917_s2 + $0x168] sm:$0xff] }
 0x2f4   : > { %1457 = vmatprep.mubr.f32.mxu0 %v3401_v17 }
 0x2f5   : > { %v3134_v47 = vpop.f32.mrb[40].mxu1 }
 0x2f6   : > { %v1945_v48 = vpop.f32.mrb[41].mxu1 }
 0x2f7   : > { %2894 = vmatmul.mubr.msk.f32.gmra.mrb[4].mxu0 %vm251_vm0, %v1355_v32  ;;  %v2964_v32 = vld [vmem:[%s3917_s2 + $0x160] sm:$0xff] }
 0x2f8   : > { %1463 = vmatprep.mubr.f32.mxu0 %v3401_v17 }
 0x2f9   : > { %v3778_v51 = vpop.f32.mrb[42].mxu1 }
 0x2fa   : > { %v1955_v54 = vpop.f32.mrb[43].mxu1 }
 0x2fb   : > { %2895 = vmatmul.mubr.msk.f32.gmra.mrb[6].mxu0 %vm251_vm0, %v3107_v31  ;;  %v3260_v31 = vpack.c.bf16 %v2967_v29, %v2965_v28 }
 0x2fc   : > { %1647 = vmatprep.mubr.f32.mxu0 %v3401_v17 }
 0x2fd   : > { %v3788_v57 = vpop.f32.mrb[44].mxu1 }
 0x2fe   : > { %v2147_v58 = vpop.f32.mrb[45].mxu1 }
 0x2ff   : > { %2906 = vmatmul.mubr.msk.f32.vlgmr.msra.gmra.mrb[0].mxu0 %vm251_vm0, %v1547_v34 }
 0x300   : > { %3231 = vmatpush1.bf16.msra.mxu0 %v3230_v55  ;;  %1653 = vmatprep.mubr.f32.mxu0 %v3401_v17 }
 0x301   : > { %3237 = vmatprep.subr.bf16.mxu0 %v3236_v56  ;;  %v3792_v59 = vpop.f32.mrb[46].mxu1 }
 0x302   : > { %v2157_v60 = vpop.f32.mrb[47].mxu1 }
 0x303   : > { %2907 = vmatmul.mubr.msk.f32.gmra.mrb[2].mxu0 %vm251_vm0, %v3114_v33  ;;  %v2966_v33 = vld [vmem:[%s3917_s2 + $0x170] sm:$0xff] }
 0x304   : > { %1659 = vmatprep.mubr.f32.mxu0 %v3401_v17  ;;  %v3262_v34 = vpack.c.bf16 %v2966_v33, %v2964_v32 }
 0x305   : > { %v3796_v61 = vpop.f32.mrb[48].mxu1 }
 0x306   : > { %v2346_v62 = vpop.f32.mrb[49].mxu1 }
 0x307   : > { %2908 = vmatmul.mubr.msk.f32.gmra.mrb[4].mxu0 %vm251_vm0, %v1557_v40 }
 0x308   : > { %1665 = vmatprep.mubr.f32.mxu0 %v3401_v17 }
 0x309   : > { %v3806_v8 = vpop.f32.mrb[50].mxu1 }
 0x30a   : > { %v2356_v12 = vpop.f32.mrb[51].mxu1 }
 0x30b   : > { %2909 = vmatmul.mubr.msk.f32.gmra.mrb[6].mxu0 %vm251_vm0, %v3117_v37  ;;  %v2682_v37 = vsub.s32 0, %v2681_v36 }
 0x30c   : > { %1846 = vmatprep.mubr.f32.mxu0 %v3401_v17 }
 0x30d   : > { %v3164_v15 = vpop.f32.mrb[52].mxu1  ;;  %v2683_v40 = vrot.slane %v2678_v38, %v2682_v37 }
 0x30e   : > { %v2545_v16 = vpop.f32.mrb[53].mxu1 }
 0x30f   : > { %2918 = vmatmul.mubr.msk.f32.vlgmr.msra.gmra.mrb[0].mxu0 %vm251_vm0, %v1746_v44 }
 0x310   : > { %3239 = vmatpush1.bf16.msra.mxu0 %v3238_v13  ;;  %1852 = vmatprep.mubr.f32.mxu0 %v3401_v17 }
 0x311   : > { %3245 = vmatprep.subr.bf16.mxu0 %v3244_v14  ;;  %v3167_v18 = vpop.f32.mrb[54].mxu1 }
 0x312   : > { %v2555_v19 = vpop.f32.mrb[55].mxu1 }
 0x313   : > { %2919 = vmatmul.mubr.msk.f32.gmra.mrb[2].mxu0 %vm251_vm0, %v3124_v43 }
 0x314   : > { %1858 = vmatprep.mubr.f32.mxu0 %v3401_v17 }
 0x317   : > { %2920 = vmatmul.mubr.msk.f32.gmra.mrb[4].mxu0 %vm251_vm0, %v1756_v46 }
 0x318   : > { %1864 = vmatprep.mubr.f32.mxu0 %v3401_v17 }
 0x31b   : > { %2921 = vmatmul.mubr.msk.f32.gmra.mrb[6].mxu0 %vm251_vm0, %v3127_v45 }
 0x31c   : > { %2045 = vmatprep.mubr.f32.mxu0 %v3401_v17 }
 0x31f   : > { %2930 = vmatmul.mubr.msk.f32.vlgmr.msra.gmra.mrb[0].mxu0 %vm251_vm0, %v1945_v48 }
 0x320   : > { %3247 = vmatpush1.bf16.msra.mxu0 %v3246_v24  ;;  %2051 = vmatprep.mubr.f32.mxu0 %v3401_v17 }
 0x321   : > { %3253 = vmatprep.subr.bf16.mxu0 %v3252_v25 }
 0x323   : > { %2931 = vmatmul.mubr.msk.f32.gmra.mrb[2].mxu0 %vm251_vm0, %v3134_v47 }
 0x324   : > { %2057 = vmatprep.mubr.f32.mxu0 %v3401_v17 }
 0x327   : > { %2932 = vmatmul.mubr.msk.f32.gmra.mrb[4].mxu0 %vm251_vm0, %v1955_v54 }
 0x328   : > { %2063 = vmatprep.mubr.f32.mxu0 %v3401_v17 }
 0x32b   : > { %2933 = vmatmul.mubr.msk.f32.gmra.mrb[6].mxu0 %vm251_vm0, %v3778_v51 }
 0x32c   : > { %2247 = vmatprep.mubr.f32.mxu0 %v3401_v17 }
 0x32f   : > { %2944 = vmatmul.mubr.msk.f32.vlgmr.msra.gmra.mrb[0].mxu0 %vm251_vm0, %v2147_v58 }
 0x330   : > { %3255 = vmatpush1.bf16.msra.mxu0 %v3254_v30  ;;  %2253 = vmatprep.mubr.f32.mxu0 %v3401_v17 }
 0x331   : > { %3261 = vmatprep.subr.bf16.mxu0 %v3260_v31 }
 0x333   : > { %2945 = vmatmul.mubr.msk.f32.gmra.mrb[2].mxu0 %vm251_vm0, %v3788_v57 }
 0x334   : > { %2259 = vmatprep.mubr.f32.mxu0 %v3401_v17 }
 0x337   : > { %2946 = vmatmul.mubr.msk.f32.gmra.mrb[4].mxu0 %vm251_vm0, %v2157_v60 }
 0x338   : > { %2265 = vmatprep.mubr.f32.mxu0 %v3401_v17 }
 0x33b   : > { %2947 = vmatmul.mubr.msk.f32.gmra.mrb[6].mxu0 %vm251_vm0, %v3792_v59 }
 0x33c   : > { %2446 = vmatprep.mubr.f32.mxu0 %v3401_v17 }
 0x33f   : > { %2956 = vmatmul.mubr.msk.f32.vlgmr.msra.gmra.mrb[0].mxu0 %vm251_vm0, %v2346_v62 }
 0x340   : > { %3263 = vmatpush1.bf16.msra.mxu0 %v3262_v34  ;;  %2452 = vmatprep.mubr.f32.mxu0 %v3401_v17 }
 0x343   : > { %2957 = vmatmul.mubr.msk.f32.gmra.mrb[2].mxu0 %vm251_vm0, %v3796_v61 }
 0x344   : > { %2458 = vmatprep.mubr.f32.mxu0 %v3401_v17 }
 0x347   : > { %2958 = vmatmul.mubr.msk.f32.gmra.mrb[4].mxu0 %vm251_vm0, %v2356_v12 }
 0x348   : > { %2464 = vmatprep.mubr.f32.mxu0 %v3401_v17 }
 0x34b   : > { %2959 = vmatmul.mubr.msk.f32.gmra.mrb[6].mxu0 %vm251_vm0, %v3806_v8 }
 0x34c   : > { %2645 = vmatprep.mubr.f32.mxu0 %v3401_v17 }
 0x34f   : > { %2968 = vmatmul.mubr.msk.f32.vlgmr.msra.gmra.mrb[0].mxu0 %vm251_vm0, %v2545_v16 }
 0x350   : > { %2651 = vmatprep.mubr.f32.mxu0 %v3401_v17 }
 0x353   : > { %2969 = vmatmul.mubr.msk.f32.gmra.mrb[2].mxu0 %vm251_vm0, %v3164_v15 }
 0x354   : > { %2657 = vmatprep.mubr.f32.mxu0 %v3401_v17 }
 0x357   : > { %2970 = vmatmul.mubr.msk.f32.gmra.mrb[4].mxu0 %vm251_vm0, %v2555_v19 }
 0x358   : > { %2663 = vmatprep.mubr.f32.mxu0 %v3401_v17 }
 0x35b   : > { %2971 = vmatmul.mubr.msk.f32.gmra.mrb[6].mxu0 %vm251_vm0, %v3167_v18 }
 0x422   : > { %v2647_v41 = vpop.f32.mrb[0].mxu0 }
 0x423   : > { %v3264_v43 = vadd.f32 %v2647_v41, %v3698_v0  ;;  %v2649_v44 = vpop.f32.mrb[1].mxu0 }
 0x424   : > { %v3265_v17 = vadd.f32 %v2649_v44, %v3700_v1 }
 0x425   : > { %v2690_v45 = vadd.f32 %v3264_v43, %v2683_v40 }
 0x426   : > { %v2691_v46 = vadd.f32 %v3265_v17, %v2687_v42  ;;  %v2653_v47 = vpop.f32.mrb[2].mxu0 }
 0x427   : > { %2698 = vst [vmem:[%s243_s22] sm:$0xff] %v2690_v45  ;;  %v3266_v48 = vadd.f32 %v2653_v47, %v3702_v2  ;;  %v2655_v49 = vpop.f32.mrb[3].mxu0 }
 0x428   : > { %2699 = vst [vmem:[%s243_s22 + $0x8] sm:$0xff] %v2691_v46  ;;  %v3267_v50 = vadd.f32 %v2655_v49, %v3704_v3 }
 0x429   : > { %v2692_v51 = vadd.f32 %v3266_v48, %v2683_v40 }
 0x42a   : > { %v2693_v0 = vadd.f32 %v3267_v50, %v2687_v42  ;;  %v2659_v52 = vpop.f32.mrb[4].mxu0 }
 0x42b   : > { %2700 = vst [vmem:[%s243_s22 + $0x10] sm:$0xff] %v2692_v51  ;;  %v3268_v53 = vadd.f32 %v2659_v52, %v3706_v4  ;;  %v2661_v54 = vpop.f32.mrb[5].mxu0 }
 0x42c   : > { %2701 = vst [vmem:[%s243_s22 + $0x18] sm:$0xff] %v2693_v0  ;;  %v3269_v1 = vadd.f32 %v2661_v54, %v3708_v5 }
 0x42d   : > { %v2694_v55 = vadd.f32 %v3268_v53, %v2683_v40 }
 0x42e   : > { %v2695_v56 = vadd.f32 %v3269_v1, %v2687_v42  ;;  %v2665_v57 = vpop.f32.mrb[6].mxu0 }
 0x42f   : > { %2702 = vst [vmem:[%s243_s22 + $0x20] sm:$0xff] %v2694_v55  ;;  %v3270_v2 = vadd.f32 %v2665_v57, %v3710_v6  ;;  %v2667_v58 = vpop.f32.mrb[7].mxu0 }
 0x430   : > { %2703 = vst [vmem:[%s243_s22 + $0x28] sm:$0xff] %v2695_v56  ;;  %v3271_v3 = vadd.f32 %v2667_v58, %v3718_v9 }
 0x431   : > { %v2696_v59 = vadd.f32 %v3270_v2, %v2683_v40 }
 0x432   : > { %v2697_v60 = vadd.f32 %v3271_v3, %v2687_v42 }
 0x433   : > { %2704 = vst [vmem:[%s243_s22 + $0x30] sm:$0xff] %v2696_v59 }
 0x434   : > { %2705 = vst [vmem:[%s243_s22 + $0x38] sm:$0xff] %v2697_v60 }
 0x435 PF: > { %s14_s17 = sadd.s32 1, %s3399_s17   ;;  %s3920_s15 = smov %s3395_s16 }
 0x436   : > { %p11_p5 = scmp.ge.s32.totalorder %s14_s17, 4   ;;  %s3921_s16 = smov %s3923_s18 }
 0x438   :  { %13 = sbr.rel (!%p11_p5) target bundleno = 2 (0x2), region = 85 }

</bundles_post_ra>
